<compile_context>
chip_gen: v5e
topology: v5e:2x2
jax: 0.10.0
libtpu: 0.0.40
codegen_flags: <defaults>
</compile_context>

<pallas_src>
import functools

import jax
import jax.numpy as jnp
from jax.experimental import pallas as pl
from jax.experimental.pallas import tpu as pltpu

_LANE = 128
_SUBLANE = 8


def _round_up(v, m):
    return (v + m - 1) // m * m


def _vmem_capacity_bytes():
    """Physical VMEM per TensorCore; conservative fallback if the query fails."""
    try:
        cap = int(pltpu.get_tpu_info().vmem_capacity_bytes)
    except Exception:
        cap = 0
    if cap < (32 << 20):
        cap = 64 << 20  # conservative fallback = v7x per-TC size
    return cap


def fc2d_kernel(x_ref, w1_ref, b1_ref, w2_ref, b2_ref, o_ref):
    # Cast x to the MXU operand dtype *inside* the kernel (no separate
    # wrapper-side HBM cast pass; the VPU cast hides under the x DMA).
    x = x_ref[...].astype(w1_ref.dtype)
    # Linear(n_input -> n_hidden_pad) on the MXU, f32 accumulation.
    h = jnp.dot(x, w1_ref[...], preferred_element_type=jnp.float32)
    # Bias + ReLU epilogue in f32 on the accumulator (v5e has no bf16 VPU).
    h = jnp.maximum(h + b1_ref[...], 0.0)
    # Linear(n_hidden_pad -> 2).  Padded hidden lanes are exactly 0 and the
    # matching W2 rows are 0, so they contribute nothing.
    y = jnp.dot(h.astype(w2_ref.dtype), w2_ref[...],
                preferred_element_type=jnp.float32)
    o_ref[...] = (y + b2_ref[...]).astype(o_ref.dtype)


@functools.partial(jax.jit, static_argnames=("block_b", "use_bf16"))
def simple_fc_2d_forward(x, w1, b1, w2, b2, *, block_b=None, use_bf16=True):
    """x: (B, C, H, W).  w1: (n_input, n_hidden) pre-transposed, w2: (n_hidden, 2).

    Returns (B, 2) float32 == ReLU(flatten(x) @ w1 + b1) @ w2 + b2.
    """
    B = x.shape[0]
    x_flat = x.reshape(B, -1)                 # nn.Flatten (metadata reshape)
    n_input = x_flat.shape[1]
    n_hidden = w1.shape[1]
    n_out = w2.shape[1]

    b1 = b1.reshape(1, n_hidden)
    b2 = b2.reshape(1, n_out)

    # --- pad hidden dim to a full 128-lane vreg row (free; compute is not the
    # bottleneck, but gives full-width epilogue vregs / clean MXU tiles) ------
    n_hid_pad = _round_up(max(n_hidden, _LANE), _LANE)
    w_dtype = jnp.bfloat16 if use_bf16 else w1.dtype
    w1_p = jnp.zeros((n_input, n_hid_pad), w_dtype).at[:, :n_hidden].set(
        w1.astype(w_dtype))
    b1_p = jnp.zeros((1, n_hid_pad), jnp.float32).at[:, :n_hidden].set(
        b1.astype(jnp.float32))
    w2_p = jnp.zeros((n_hid_pad, n_out), w_dtype).at[:n_hidden, :].set(
        w2.astype(w_dtype))
    b2_p = b2.astype(jnp.float32)

    # --- generation-aware batch tile; NO wrapper-side padding of x ----------
    vmem_cap = _vmem_capacity_bytes()
    x_itemsize = x_flat.dtype.itemsize
    if block_b is None:
        # Double-buffered x tiles should use at most ~1/3 of VMEM.
        cap_rows = (vmem_cap // 3) // (2 * n_input * x_itemsize)
        cap_rows = max(_SUBLANE, (cap_rows // _SUBLANE) * _SUBLANE)
        upper = 2048 if vmem_cap <= (96 << 20) else 4096   # v7x vs v5e/v6e
        block_b = int(min(upper, cap_rows))
    if B <= block_b:
        tb = B                              # one block; block dim == array dim
    else:
        tb = _round_up(block_b, _SUBLANE)
    # Ragged last tile: rows are independent; OOB rows are dropped on write.
    grid = (pl.cdiv(B, tb),)

    # --- VMEM budget (double-buffered tiles + resident weights + headroom) ---
    w_itemsize = jnp.dtype(w_dtype).itemsize
    n_out_lane = max(n_out, _LANE)          # lane-padded VMEM footprint
    x_tile_b = tb * n_input * x_itemsize
    out_tile_b = tb * n_out_lane * 4
    resident_b = ((n_input + n_out_lane) * n_hid_pad * w_itemsize
                  + (n_hid_pad + n_out_lane) * 4)
    h_b = tb * n_hid_pad * 4
    vmem_need = 2 * (x_tile_b + out_tile_b + resident_b) + 2 * h_b + (4 << 20)
    vmem_limit = int(min(max(vmem_need, 16 << 20), vmem_cap - (16 << 20)))

    cost = pl.CostEstimate(
        flops=2 * B * n_input * n_hidden + 2 * B * n_hidden * n_out,
        transcendentals=0,
        bytes_accessed=(x_flat.size * x_itemsize
                        + (w1_p.size + w2_p.size) * w_itemsize
                        + (b1_p.size + b2_p.size) * 4
                        + B * n_out * 4),
    )

    out = pl.pallas_call(
        fc2d_kernel,
        out_shape=jax.ShapeDtypeStruct((B, n_out), jnp.float32),
        grid=grid,
        in_specs=[
            pl.BlockSpec((tb, n_input), lambda i: (i, 0)),         # x tile (pipelined, f32)
            pl.BlockSpec((n_input, n_hid_pad), lambda i: (0, 0)),  # W1 (resident)
            pl.BlockSpec((1, n_hid_pad), lambda i: (0, 0)),        # b1 (resident)
            pl.BlockSpec((n_hid_pad, n_out), lambda i: (0, 0)),    # W2 (resident)
            pl.BlockSpec((1, n_out), lambda i: (0, 0)),            # b2 (resident)
        ],
        out_specs=pl.BlockSpec((tb, n_out), lambda i: (i, 0)),     # (B, 2) direct
        compiler_params=pltpu.CompilerParams(
            # On v7x, if a trace shows one TC doing all steps, switch this to
            # pltpu.CORE_PARALLEL for the batch axis.
            dimension_semantics=("parallel",),
            vmem_limit_bytes=vmem_limit,
        ),
        cost_estimate=cost,
    )(x_flat, w1_p, b1_p, w2_p, b2_p)
    return out


def init_params(key, n_input, n_hidden):
    """Deterministic init mirroring nn.Linear default (uniform +/-1/sqrt(fan_in))."""
    k1, k2, k3, k4 = jax.random.split(key, 4)
    bound1 = 1.0 / jnp.sqrt(n_input)
    bound2 = 1.0 / jnp.sqrt(n_hidden)
    # weights stored pre-transposed to (in, out)
    w1 = jax.random.uniform(k1, (n_input, n_hidden), jnp.float32, -bound1, bound1)
    b1 = jax.random.uniform(k2, (1, n_hidden), jnp.float32, -bound1, bound1)
    w2 = jax.random.uniform(k3, (n_hidden, 2), jnp.float32, -bound2, bound2)
    b2 = jax.random.uniform(k4, (1, 2), jnp.float32, -bound2, bound2)
    return w1, b1, w2, b2


if __name__ == "__main__":
    key = jax.random.PRNGKey(0)
    kx, kp, kx2 = jax.random.split(key, 3)

    # Small shapes consistent with the module: x is (B, C, H, W), flattened.
    B, C, H, W = 2, 4, 16, 16
    n_input = C * H * W          # 1024
    n_hidden = 32

    x = jax.random.normal(kx, (B, C, H, W), jnp.float32)
    w1, b1, w2, b2 = init_params(kp, n_input, n_hidden)

    def ref_forward(xx):
        return jnp.maximum(xx.reshape(xx.shape[0], -1) @ w1 + b1, 0.0) @ w2 + b2

    # f32 path: checks layout / hidden-pad / output-write correctness.
    out_f32 = jax.block_until_ready(
        simple_fc_2d_forward(x, w1, b1, w2, b2, use_bf16=False))
    assert out_f32.shape == (B, 2)
    assert jnp.allclose(out_f32, ref_forward(x), atol=5e-3, rtol=1e-2)

    # bf16-MXU path (recommended on v6e/v7x): looser tolerance.
    out_bf16 = jax.block_until_ready(
        simple_fc_2d_forward(x, w1, b1, w2, b2, use_bf16=True))
    assert out_bf16.shape == (B, 2)
    assert jnp.allclose(out_bf16, ref_forward(x), atol=5e-2, rtol=5e-2)

    # Ragged multi-tile path: B not a multiple of the batch tile (exercises the
    # cdiv grid + masked write of the partial last tile).
    B2 = 37
    x2 = jax.random.normal(kx2, (B2, C, H, W), jnp.float32)
    out_rag = jax.block_until_ready(
        simple_fc_2d_forward(x2, w1, b1, w2, b2, block_b=16, use_bf16=False))
    assert out_rag.shape == (B2, 2)
    assert jnp.allclose(out_rag, ref_forward(x2), atol=5e-3, rtol=1e-2)

    print("KERNEL_OK")
</pallas_src>

<mosaic_0001>
module attributes {stable_mosaic.version = 11 : i64} {
  func.func @fc2d_kernel(%arg0: i32, %arg1: memref<2x1024xf32, #tpu.memory_space<vmem>>, %arg2: memref<1024x128xf32, #tpu.memory_space<vmem>>, %arg3: memref<1x128xf32, #tpu.memory_space<vmem>>, %arg4: memref<128x2xf32, #tpu.memory_space<vmem>>, %arg5: memref<1x2xf32, #tpu.memory_space<vmem>>, %arg6: memref<2x2xf32, #tpu.memory_space<vmem>>) attributes {dimension_semantics = [#tpu.dimension_semantics<parallel>], iteration_bounds = array<i64: 1>, scalar_prefetch = 0 : i64, scratch_operands = 0 : i64, tpu.core_type = #tpu.core_type<tc>, window_params = [{transform_indices = @transform_0, window_bounds = array<i64: 2, 1024>}, {pipeline_mode = #tpu.pipeline_mode<synchronous>, transform_indices = @transform_1, window_bounds = array<i64: 1024, 128>}, {pipeline_mode = #tpu.pipeline_mode<synchronous>, transform_indices = @transform_2, window_bounds = array<i64: 1, 128>}, {pipeline_mode = #tpu.pipeline_mode<synchronous>, transform_indices = @transform_3, window_bounds = array<i64: 128, 2>}, {pipeline_mode = #tpu.pipeline_mode<synchronous>, transform_indices = @transform_4, window_bounds = array<i64: 1, 2>}, {transform_indices = @transform_5, window_bounds = array<i64: 2, 2>}]} {
    %c0 = arith.constant 0 : index
    %c0_0 = arith.constant 0 : index
    %0 = vector.load %arg1[%c0, %c0_0] : memref<2x1024xf32, #tpu.memory_space<vmem>>, vector<2x1024xf32>
    %c0_1 = arith.constant 0 : index
    %c0_2 = arith.constant 0 : index
    %1 = vector.load %arg2[%c0_1, %c0_2] : memref<1024x128xf32, #tpu.memory_space<vmem>>, vector<1024x128xf32>
    %cst = arith.constant dense<0.000000e+00> : vector<2x128xf32>
    %2 = tpu.matmul %0, %1, %cst {dimension_numbers = #tpu.dot_dimension_numbers<[1], [0], [0], [1], [0, 0, 1, 1], [], []>} : vector<2x1024xf32>, vector<1024x128xf32>, vector<2x128xf32> -> vector<2x128xf32>
    %c0_3 = arith.constant 0 : index
    %c0_4 = arith.constant 0 : index
    %3 = vector.load %arg3[%c0_3, %c0_4] : memref<1x128xf32, #tpu.memory_space<vmem>>, vector<1x128xf32>
    %4 = vector.broadcast %3 : vector<1x128xf32> to vector<2x128xf32>
    %5 = arith.addf %2, %4 : vector<2x128xf32>
    %cst_5 = arith.constant 0.000000e+00 : f32
    %6 = vector.broadcast %cst_5 : f32 to vector<2x128xf32>
    %7 = arith.maximumf %5, %6 : vector<2x128xf32>
    %c0_6 = arith.constant 0 : index
    %c0_7 = arith.constant 0 : index
    %8 = vector.load %arg4[%c0_6, %c0_7] : memref<128x2xf32, #tpu.memory_space<vmem>>, vector<128x2xf32>
    %cst_8 = arith.constant dense<0.000000e+00> : vector<2x2xf32>
    %9 = tpu.matmul %7, %8, %cst_8 {dimension_numbers = #tpu.dot_dimension_numbers<[1], [0], [0], [1], [0, 0, 1, 1], [], []>} : vector<2x128xf32>, vector<128x2xf32>, vector<2x2xf32> -> vector<2x2xf32>
    %c0_9 = arith.constant 0 : index
    %c0_10 = arith.constant 0 : index
    %10 = vector.load %arg5[%c0_9, %c0_10] : memref<1x2xf32, #tpu.memory_space<vmem>>, vector<1x2xf32>
    %11 = vector.broadcast %10 : vector<1x2xf32> to vector<2x2xf32>
    %12 = arith.addf %9, %11 : vector<2x2xf32>
    %c0_11 = arith.constant 0 : index
    %c0_12 = arith.constant 0 : index
    %13 = vector.load %arg6[%c0_11, %c0_12] : memref<2x2xf32, #tpu.memory_space<vmem>>, vector<2x2xf32>
    tpu.vector_store %arg6[%c0_11, %c0_12], %12 {strides = array<i32>} : memref<2x2xf32, #tpu.memory_space<vmem>>, vector<2x2xf32>,
    return
  }
  func.func @transform_0(%arg0: i32) -> (i32, i32) {
    %c0_i32 = arith.constant 0 : i32
    %c0_i32_0 = arith.constant 0 : i32
    return %arg0, %c0_i32 : i32, i32
  }
  func.func @transform_1(%arg0: i32) -> (i32, i32) {
    %c0_i32 = arith.constant 0 : i32
    %c0_i32_0 = arith.constant 0 : i32
    %c0_i32_1 = arith.constant 0 : i32
    return %c0_i32, %c0_i32_0 : i32, i32
  }
  func.func @transform_2(%arg0: i32) -> (i32, i32) {
    %c0_i32 = arith.constant 0 : i32
    %c0_i32_0 = arith.constant 0 : i32
    %c0_i32_1 = arith.constant 0 : i32
    return %c0_i32, %c0_i32_0 : i32, i32
  }
  func.func @transform_3(%arg0: i32) -> (i32, i32) {
    %c0_i32 = arith.constant 0 : i32
    %c0_i32_0 = arith.constant 0 : i32
    %c0_i32_1 = arith.constant 0 : i32
    return %c0_i32, %c0_i32_0 : i32, i32
  }
  func.func @transform_4(%arg0: i32) -> (i32, i32) {
    %c0_i32 = arith.constant 0 : i32
    %c0_i32_0 = arith.constant 0 : i32
    %c0_i32_1 = arith.constant 0 : i32
    return %c0_i32, %c0_i32_0 : i32, i32
  }
  func.func @transform_5(%arg0: i32) -> (i32, i32) {
    %c0_i32 = arith.constant 0 : i32
    %c0_i32_0 = arith.constant 0 : i32
    return %arg0, %c0_i32 : i32, i32
  }
}

</mosaic_0001>

<bundles_post_ra>
// kernel: simple_fc_2d_forward.1
= control target key start
LH: loop header
LB: loop body
LE: loop exit
PB: predicated region body
PF: predicated region fallthrough
CT: control target
= control target key end

     0   :  { %s902_s0 = inlined_call_operand.vmem [shape: f32[2,1024], index: 0, kind: input, shape index: {}]   ;;  %s903_s1 = inlined_call_operand.vmem [shape: f32[1024,128], index: 1, kind: input, shape index: {}]   ;;  %s904_s2 = inlined_call_operand.vmem [shape: f32[1,128], index: 2, kind: input, shape index: {}]   ;;  %s905_s3 = inlined_call_operand.vmem [shape: f32[128,2], index: 3, kind: input, shape index: {}]   ;;  %s906_s4 = inlined_call_operand.vmem [shape: f32[1,2], index: 4, kind: input, shape index: {}]   ;;  %s907_s5 = inlined_call_operand.hbm [shape: f32[2,2], index: 5, kind: output, shape index: {}]  }
   0x1   :  { %v70_v0 = vld [vmem:[%s903_s1 + $0x178] sm:$0xff]  ;;  %v69_v2 = vld [vmem:[%s903_s1 + $0x170] sm:$0xff]  ;;  %v68_v6 = vld [vmem:[%s903_s1 + $0x168] sm:$0xff] }
   0x2   :  { %v38_v1 = vld [vmem:[%s903_s1 + $0x78] sm:$0xff]  ;;  %216 = vmatpush.msra.mxu2 %v70_v0  ;;  %v37_v4 = vld [vmem:[%s903_s1 + $0x70] sm:$0xff]  ;;  %v36_v8 = vld [vmem:[%s903_s1 + $0x68] sm:$0xff] }
   0x3   :  { %176 = vmatpush.msra.mxu0 %v38_v1  ;;  %v86_v3 = vld [vmem:[%s903_s1 + $0x1f8] sm:$0xff]  ;;  %v85_v7 = vld [vmem:[%s903_s1 + $0x1f0] sm:$0xff]  ;;  %v84_v10 = vld [vmem:[%s903_s1 + $0x1e8] sm:$0xff] }
   0x4   :  { %v54_v5 = vld [vmem:[%s903_s1 + $0xf8] sm:$0xff]  ;;  %236 = vmatpush.msra.mxu3 %v86_v3  ;;  %217 = vmatpush.msra.mxu2 %v69_v2  ;;  %v53_v9 = vld [vmem:[%s903_s1 + $0xf0] sm:$0xff]  ;;  %v67_v11 = vld [vmem:[%s903_s1 + $0x160] sm:$0xff] }
   0x5   :  { %196 = vmatpush.msra.mxu1 %v54_v5  ;;  %177 = vmatpush.msra.mxu0 %v37_v4  ;;  %v35_v12 = vld [vmem:[%s903_s1 + $0x60] sm:$0xff]  ;;  %v52_v13 = vld [vmem:[%s903_s1 + $0xe8] sm:$0xff]  ;;  %v66_v16 = vld [vmem:[%s903_s1 + $0x158] sm:$0xff] }
   0x6   :  { %237 = vmatpush.msra.mxu3 %v85_v7  ;;  %218 = vmatpush.msra.mxu2 %v68_v6  ;;  %v83_v14 = vld [vmem:[%s903_s1 + $0x1e0] sm:$0xff]  ;;  %v34_v17 = vld [vmem:[%s903_s1 + $0x58] sm:$0xff]  ;;  %v65_v20 = vld [vmem:[%s903_s1 + $0x150] sm:$0xff] }
   0x7   :  { %197 = vmatpush.msra.mxu1 %v53_v9  ;;  %178 = vmatpush.msra.mxu0 %v36_v8  ;;  %v51_v15 = vld [vmem:[%s903_s1 + $0xe0] sm:$0xff]  ;;  %v82_v18 = vld [vmem:[%s903_s1 + $0x1d8] sm:$0xff]  ;;  %v33_v21 = vld [vmem:[%s903_s1 + $0x50] sm:$0xff] }
   0x8   :  { %238 = vmatpush.msra.mxu3 %v84_v10  ;;  %219 = vmatpush.msra.mxu2 %v67_v11  ;;  %v50_v19 = vld [vmem:[%s903_s1 + $0xd8] sm:$0xff]  ;;  %v81_v22 = vld [vmem:[%s903_s1 + $0x1d0] sm:$0xff]  ;;  %v64_v24 = vld [vmem:[%s903_s1 + $0x148] sm:$0xff] }
   0x9   :  { %198 = vmatpush.msra.mxu1 %v52_v13  ;;  %179 = vmatpush.msra.mxu0 %v35_v12  ;;  %v49_v23 = vld [vmem:[%s903_s1 + $0xd0] sm:$0xff]  ;;  %v32_v25 = vld [vmem:[%s903_s1 + $0x48] sm:$0xff]  ;;  %v63_v28 = vld [vmem:[%s903_s1 + $0x140] sm:$0xff] }
   0xa   :  { %239 = vmatpush.msra.mxu3 %v83_v14  ;;  %220 = vmatpush.msra.mxu2 %v66_v16  ;;  %v80_v26 = vld [vmem:[%s903_s1 + $0x1c8] sm:$0xff]  ;;  %v31_v29 = vld [vmem:[%s903_s1 + $0x40] sm:$0xff]  ;;  %v62_v32 = vld [vmem:[%s903_s1 + $0x138] sm:$0xff] }
   0xb   :  { %199 = vmatpush.msra.mxu1 %v51_v15  ;;  %180 = vmatpush.msra.mxu0 %v34_v17  ;;  %v48_v27 = vld [vmem:[%s903_s1 + $0xc8] sm:$0xff]  ;;  %v79_v30 = vld [vmem:[%s903_s1 + $0x1c0] sm:$0xff]  ;;  %v30_v33 = vld [vmem:[%s903_s1 + $0x38] sm:$0xff] }
   0xc   :  { %240 = vmatpush.msra.mxu3 %v82_v18  ;;  %221 = vmatpush.msra.mxu2 %v65_v20  ;;  %v47_v31 = vld [vmem:[%s903_s1 + $0xc0] sm:$0xff]  ;;  %v78_v34 = vld [vmem:[%s903_s1 + $0x1b8] sm:$0xff]  ;;  %v61_v36 = vld [vmem:[%s903_s1 + $0x130] sm:$0xff] }
   0xd   :  { %200 = vmatpush.msra.mxu1 %v50_v19  ;;  %181 = vmatpush.msra.mxu0 %v33_v21  ;;  %v46_v35 = vld [vmem:[%s903_s1 + $0xb8] sm:$0xff]  ;;  %v29_v37 = vld [vmem:[%s903_s1 + $0x30] sm:$0xff]  ;;  %v60_v40 = vld [vmem:[%s903_s1 + $0x128] sm:$0xff] }
   0xe   :  { %241 = vmatpush.msra.mxu3 %v81_v22  ;;  %222 = vmatpush.msra.mxu2 %v64_v24  ;;  %v77_v38 = vld [vmem:[%s903_s1 + $0x1b0] sm:$0xff]  ;;  %v28_v41 = vld [vmem:[%s903_s1 + $0x28] sm:$0xff]  ;;  %v59_v44 = vld [vmem:[%s903_s1 + $0x120] sm:$0xff] }
   0xf   :  { %201 = vmatpush.msra.mxu1 %v49_v23  ;;  %182 = vmatpush.msra.mxu0 %v32_v25  ;;  %v45_v39 = vld [vmem:[%s903_s1 + $0xb0] sm:$0xff]  ;;  %v76_v42 = vld [vmem:[%s903_s1 + $0x1a8] sm:$0xff]  ;;  %v27_v45 = vld [vmem:[%s903_s1 + $0x20] sm:$0xff] }
  0x10   :  { %242 = vmatpush.msra.mxu3 %v80_v26  ;;  %223 = vmatpush.msra.mxu2 %v63_v28  ;;  %v44_v43 = vld [vmem:[%s903_s1 + $0xa8] sm:$0xff]  ;;  %v75_v46 = vld [vmem:[%s903_s1 + $0x1a0] sm:$0xff]  ;;  %v58_v48 = vld [vmem:[%s903_s1 + $0x118] sm:$0xff] }
  0x11   :  { %202 = vmatpush.msra.mxu1 %v48_v27  ;;  %183 = vmatpush.msra.mxu0 %v31_v29  ;;  %v43_v47 = vld [vmem:[%s903_s1 + $0xa0] sm:$0xff]  ;;  %v26_v49 = vld [vmem:[%s903_s1 + $0x18] sm:$0xff]  ;;  %v57_v52 = vld [vmem:[%s903_s1 + $0x110] sm:$0xff] }
  0x12   :  { %243 = vmatpush.msra.mxu3 %v79_v30  ;;  %224 = vmatpush.msra.mxu2 %v62_v32  ;;  %v74_v50 = vld [vmem:[%s903_s1 + $0x198] sm:$0xff]  ;;  %v25_v53 = vld [vmem:[%s903_s1 + $0x10] sm:$0xff]  ;;  %v56_v56 = vld [vmem:[%s903_s1 + $0x108] sm:$0xff] }
  0x13   :  { %203 = vmatpush.msra.mxu1 %v47_v31  ;;  %184 = vmatpush.msra.mxu0 %v30_v33  ;;  %v42_v51 = vld [vmem:[%s903_s1 + $0x98] sm:$0xff]  ;;  %v73_v54 = vld [vmem:[%s903_s1 + $0x190] sm:$0xff]  ;;  %v24_v57 = vld [vmem:[%s903_s1 + $0x8] sm:$0xff] }
  0x14   :  { %244 = vmatpush.msra.mxu3 %v78_v34  ;;  %225 = vmatpush.msra.mxu2 %v61_v36  ;;  %v41_v55 = vld [vmem:[%s903_s1 + $0x90] sm:$0xff]  ;;  %v72_v58 = vld [vmem:[%s903_s1 + $0x188] sm:$0xff]  ;;  %v55_v60 = vld [vmem:[%s903_s1 + $0x100] sm:$0xff] }
  0x15   :  { %204 = vmatpush.msra.mxu1 %v46_v35  ;;  %185 = vmatpush.msra.mxu0 %v29_v37  ;;  %v40_v59 = vld [vmem:[%s903_s1 + $0x88] sm:$0xff]  ;;  %v23_v61 = vld [vmem:[%s903_s1] sm:$0xff]  ;;  %v134_v62 = vld [vmem:[%s903_s1 + $0x378] sm:$0xff] }
  0x16   :  { %245 = vmatpush.msra.mxu3 %v77_v38  ;;  %226 = vmatpush.msra.mxu2 %v60_v40  ;;  %v71_v63 = vld [vmem:[%s903_s1 + $0x180] sm:$0xff]  ;;  %v102_v0 = vld [vmem:[%s903_s1 + $0x278] sm:$0xff]  ;;  %v133_v2 = vld [vmem:[%s903_s1 + $0x370] sm:$0xff] }
  0x17   :  { %205 = vmatpush.msra.mxu1 %v45_v39  ;;  %186 = vmatpush.msra.mxu0 %v28_v41  ;;  %v150_v1 = vld [vmem:[%s903_s1 + $0x3f8] sm:$0xff]  ;;  %v39_v3 = vld [vmem:[%s903_s1 + $0x80] sm:$0xff]  ;;  %v101_v4 = vld [vmem:[%s903_s1 + $0x270] sm:$0xff] }
  0x18   :  { %246 = vmatpush.msra.mxu3 %v76_v42  ;;  %227 = vmatpush.msra.mxu2 %v59_v44  ;;  %v118_v5 = vld [vmem:[%s903_s1 + $0x2f8] sm:$0xff]  ;;  %v132_v6 = vld [vmem:[%s903_s1 + $0x368] sm:$0xff]  ;;  %v149_v7 = vld [vmem:[%s903_s1 + $0x3f0] sm:$0xff] }
  0x19   :  { %206 = vmatpush.msra.mxu1 %v44_v43  ;;  %187 = vmatpush.msra.mxu0 %v27_v45  ;;  %v100_v8 = vld [vmem:[%s903_s1 + $0x268] sm:$0xff]  ;;  %v117_v9 = vld [vmem:[%s903_s1 + $0x2f0] sm:$0xff]  ;;  %v131_v10 = vld [vmem:[%s903_s1 + $0x360] sm:$0xff] }
  0x1a   :  { %247 = vmatpush.msra.mxu3 %v75_v46  ;;  %228 = vmatpush.msra.mxu2 %v58_v48  ;;  %v148_v11 = vld [vmem:[%s903_s1 + $0x3e8] sm:$0xff]  ;;  %v99_v12 = vld [vmem:[%s903_s1 + $0x260] sm:$0xff]  ;;  %v130_v15 = vld [vmem:[%s903_s1 + $0x358] sm:$0xff] }
  0x1b   :  { %207 = vmatpush.msra.mxu1 %v43_v47  ;;  %188 = vmatpush.msra.mxu0 %v26_v49  ;;  %v116_v13 = vld [vmem:[%s903_s1 + $0x2e8] sm:$0xff]  ;;  %v21_v14 = vld [vmem:[%s902_s0] sm:$0xff]  ;;  %v98_v17 = vld [vmem:[%s903_s1 + $0x258] sm:$0xff] }
  0x1c   :  { %248 = vmatpush.msra.mxu3 %v74_v50  ;;  %229 = vmatpush.msra.mxu2 %v57_v52  ;;  %v147_v16 = vld [vmem:[%s903_s1 + $0x3e0] sm:$0xff]  ;;  %157 = vst [vmem:[#allocation1] ss:$4 sm:$0xff] %v21_v14  ;;  %v129_v19 = vld [vmem:[%s903_s1 + $0x350] sm:$0xff]  ;;  %v146_v20 = vld [vmem:[%s903_s1 + $0x3d8] sm:$0xff] }
  0x1d   :  { %208 = vmatpush.msra.mxu1 %v42_v51  ;;  %189 = vmatpush.msra.mxu0 %v25_v53  ;;  %v115_v18 = vld [vmem:[%s903_s1 + $0x2e0] sm:$0xff]  ;;  %v97_v21 = vld [vmem:[%s903_s1 + $0x250] sm:$0xff]  ;;  %v114_v22 = vld [vmem:[%s903_s1 + $0x2d8] sm:$0xff] }
  0x1e   :  { %249 = vmatpush.msra.mxu3 %v73_v54  ;;  %230 = vmatpush.msra.mxu2 %v56_v56  ;;  %v128_v23 = vld [vmem:[%s903_s1 + $0x348] sm:$0xff]  ;;  %v145_v24 = vld [vmem:[%s903_s1 + $0x3d0] sm:$0xff]  ;;  %v127_v28 = vld [vmem:[%s903_s1 + $0x340] sm:$0xff] }
  0x1f   :  { %209 = vmatpush.msra.mxu1 %v41_v55  ;;  %190 = vmatpush.msra.mxu0 %v24_v57  ;;  %v22_v25 = vld [vmem:[%s902_s0 + $0x8] sm:$0xff]  ;;  %v113_v27 = vld [vmem:[%s903_s1 + $0x2d0] sm:$0xff]  ;;  %v95_v30 = vld [vmem:[%s903_s1 + $0x240] sm:$0xff] }
  0x20   :  { %250 = vmatpush.msra.mxu3 %v72_v58  ;;  %231 = vmatpush.msra.mxu2 %v55_v60  ;;  %v96_v26 = vld [vmem:[%s903_s1 + $0x248] sm:$0xff]  ;;  %159 = vst [vmem:[#allocation1 + $0x20] ss:$4 sm:$0xff] %v22_v25  ;;  %v126_v32 = vld [vmem:[%s903_s1 + $0x338] sm:$0xff]  ;;  %v143_v33 = vld [vmem:[%s903_s1 + $0x3c0] sm:$0xff] }
  0x21   :  { %210 = vmatpush.msra.mxu1 %v40_v59  ;;  %191 = vmatpush.msra.mxu0 %v23_v61  ;;  %v144_v29 = vld [vmem:[%s903_s1 + $0x3c8] sm:$0xff]  ;;  %v94_v34 = vld [vmem:[%s903_s1 + $0x238] sm:$0xff]  ;;  %v111_v35 = vld [vmem:[%s903_s1 + $0x2c0] sm:$0xff] }
  0x22   :  { %296 = vmatpush.msrb.mxu2 %v134_v62  ;;  %251 = vmatpush.msra.mxu3 %v71_v63  ;;  %v112_v31 = vld [vmem:[%s903_s1 + $0x2c8] sm:$0xff]  ;;  %v125_v36 = vld [vmem:[%s903_s1 + $0x330] sm:$0xff]  ;;  %v142_v37 = vld [vmem:[%s903_s1 + $0x3b8] sm:$0xff] }
  0x23   :  { %256 = vmatpush.msrb.mxu0 %v102_v0  ;;  %211 = vmatpush.msra.mxu1 %v39_v3  ;;  %v93_v38 = vld [vmem:[%s903_s1 + $0x230] sm:$0xff]  ;;  %v110_v39 = vld [vmem:[%s903_s1 + $0x2b8] sm:$0xff] }
  0x24   :  { %316 = vmatpush.msrb.mxu3 %v150_v1  ;;  %297 = vmatpush.msrb.mxu2 %v133_v2 }
  0x25   :  { %257 = vmatpush.msrb.mxu0 %v101_v4  ;;  %276 = vmatpush.msrb.mxu1 %v118_v5 }
  0x26   :  { %298 = vmatpush.msrb.mxu2 %v132_v6  ;;  %317 = vmatpush.msrb.mxu3 %v149_v7 }
  0x27   :  { %258 = vmatpush.msrb.mxu0 %v100_v8  ;;  %277 = vmatpush.msrb.mxu1 %v117_v9 }
  0x28   :  { %299 = vmatpush.msrb.mxu2 %v131_v10  ;;  %318 = vmatpush.msrb.mxu3 %v148_v11 }
  0x29   :  { %259 = vmatpush.msrb.mxu0 %v99_v12  ;;  %278 = vmatpush.msrb.mxu1 %v116_v13 }
  0x2a   :  { %300 = vmatpush.msrb.mxu2 %v130_v15  ;;  %319 = vmatpush.msrb.mxu3 %v147_v16 }
  0x2b   :  { %260 = vmatpush.msrb.mxu0 %v98_v17  ;;  %279 = vmatpush.msrb.mxu1 %v115_v18 }
  0x2c   :  { %301 = vmatpush.msrb.mxu2 %v129_v19  ;;  %320 = vmatpush.msrb.mxu3 %v146_v20 }
  0x2d   :  { %261 = vmatpush.msrb.mxu0 %v97_v21  ;;  %280 = vmatpush.msrb.mxu1 %v114_v22 }
  0x2e   :  { %302 = vmatpush.msrb.mxu2 %v128_v23  ;;  %321 = vmatpush.msrb.mxu3 %v145_v24 }
  0x2f   :  { %262 = vmatpush.msrb.mxu0 %v96_v26  ;;  %281 = vmatpush.msrb.mxu1 %v113_v27 }
  0x30   :  { %303 = vmatpush.msrb.mxu2 %v127_v28  ;;  %322 = vmatpush.msrb.mxu3 %v144_v29 }
  0x31   :  { %263 = vmatpush.msrb.mxu0 %v95_v30  ;;  %282 = vmatpush.msrb.mxu1 %v112_v31 }
  0x32   :  { %304 = vmatpush.msrb.mxu2 %v126_v32  ;;  %323 = vmatpush.msrb.mxu3 %v143_v33 }
  0x33   :  { %10 = vsyncpa [#allocation3], 0  ;;  %264 = vmatpush.msrb.mxu0 %v94_v34  ;;  %283 = vmatpush.msrb.mxu1 %v111_v35  ;;  %v124_v40 = vld [vmem:[%s903_s1 + $0x328] sm:$0xff]  ;;  %v141_v41 = vld [vmem:[%s903_s1 + $0x3b0] sm:$0xff]  ;;  %s424_s0 = smov [#allocation2]   ;;  %s386_s9 = sshll.u32 %s907_s5, 4  ;;  %s387_s9 = int_to_ptr.hbm [resolvable:$true] %s386_s9 }
  0x34   :  { %305 = vmatpush.msrb.mxu2 %v125_v36  ;;  %324 = vmatpush.msrb.mxu3 %v142_v37  ;;  %v92_v42 = vld [vmem:[%s903_s1 + $0x228] sm:$0xff]  ;;  %v109_v43 = vld [vmem:[%s903_s1 + $0x2b0] sm:$0xff]  ;;  %v123_v44 = vld [vmem:[%s903_s1 + $0x320] sm:$0xff]  ;;  %s384_s6 = sshll.u32 %s424_s0, 4  ;;  %vm377_vm0 = vcmask 9216   ;;  %s385_s6 = int_to_ptr.vmem [resolvable:$true] %s384_s6 }
  0x35   :  { %265 = vmatpush.msrb.mxu0 %v93_v38  ;;  %284 = vmatpush.msrb.mxu1 %v110_v39  ;;  %v140_v45 = vld [vmem:[%s903_s1 + $0x3a8] sm:$0xff]  ;;  %v162_v46 = vld.sshfl [vmem:[#allocation1 + $0x10] sm:$0xff pattern:$0x73625140]  ;;  %v91_v47 = vld [vmem:[%s903_s1 + $0x220] sm:$0xff] }
  0x36   :  { %306 = vmatpush.msrb.mxu2 %v124_v40  ;;  %325 = vmatpush.msrb.mxu3 %v141_v41  ;;  %v108_v48 = vld [vmem:[%s903_s1 + $0x2a8] sm:$0xff]  ;;  %v122_v49 = vld [vmem:[%s903_s1 + $0x318] sm:$0xff]  ;;  %v139_v50 = vld [vmem:[%s903_s1 + $0x3a0] sm:$0xff] }
  0x37   :  { %266 = vmatpush.msrb.mxu0 %v92_v42  ;;  %285 = vmatpush.msrb.mxu1 %v109_v43  ;;  %v160_v51 = vld.sshfl [vmem:[#allocation1] sm:$0xff pattern:$0x73625140]  ;;  %v163_v52 = vld.sshfl [vmem:[#allocation1 + $0x18] sm:$0xff pattern:$0x73625140] }
  0x38   :  { %307 = vmatpush.msrb.mxu2 %v123_v44  ;;  %326 = vmatpush.msrb.mxu3 %v140_v45  ;;  %v90_v53 = vld [vmem:[%s903_s1 + $0x218] sm:$0xff]  ;;  %v107_v54 = vld [vmem:[%s903_s1 + $0x2a0] sm:$0xff]  ;;  %v121_v55 = vld [vmem:[%s903_s1 + $0x310] sm:$0xff] }
  0x39   :  { %232 = vmatmul.f32.vlgmr.msra.gmra.mxu2 %v162_v46  ;;  %267 = vmatpush.msrb.mxu0 %v91_v47  ;;  %v138_v56 = vld [vmem:[%s903_s1 + $0x398] sm:$0xff]  ;;  %v161_v57 = vld.sshfl [vmem:[#allocation1 + $0x8] sm:$0xff pattern:$0x73625140]  ;;  %v89_v58 = vld [vmem:[%s903_s1 + $0x210] sm:$0xff] }
  0x3a   :  { %286 = vmatpush.msrb.mxu1 %v108_v48  ;;  %308 = vmatpush.msrb.mxu2 %v122_v49  ;;  %v106_v59 = vld [vmem:[%s903_s1 + $0x298] sm:$0xff]  ;;  %v120_v60 = vld [vmem:[%s903_s1 + $0x308] sm:$0xff]  ;;  %v137_v61 = vld [vmem:[%s903_s1 + $0x390] sm:$0xff] }
  0x3b   :  { %327 = vmatpush.msrb.mxu3 %v139_v50  ;;  %192 = vmatmul.f32.vlgmr.msra.gmra.mxu0 %v160_v51  ;;  %v88_v62 = vld [vmem:[%s903_s1 + $0x208] sm:$0xff]  ;;  %v105_v63 = vld [vmem:[%s903_s1 + $0x290] sm:$0xff]  ;;  %v119_v0 = vld [vmem:[%s903_s1 + $0x300] sm:$0xff] }
  0x3c   :  { %252 = vmatmul.f32.vlgmr.msra.gmra.mxu3 %v163_v52  ;;  %268 = vmatpush.msrb.mxu0 %v90_v53  ;;  %v136_v1 = vld [vmem:[%s903_s1 + $0x388] sm:$0xff]  ;;  %v166_v2 = vld.sshfl [vmem:[#allocation1 + $0x30] sm:$0xff pattern:$0x73625140]  ;;  %v87_v3 = vld [vmem:[%s903_s1 + $0x200] sm:$0xff] }
  0x3d   :  { %287 = vmatpush.msrb.mxu1 %v107_v54  ;;  %309 = vmatpush.msrb.mxu2 %v121_v55  ;;  %v104_v4 = vld [vmem:[%s903_s1 + $0x288] sm:$0xff]  ;;  %v135_v5 = vld [vmem:[%s903_s1 + $0x380] sm:$0xff]  ;;  %v167_v7 = vld.sshfl [vmem:[#allocation1 + $0x38] sm:$0xff pattern:$0x73625140] }
  0x3e   :  { %328 = vmatpush.msrb.mxu3 %v138_v56  ;;  %212 = vmatmul.f32.vlgmr.msra.gmra.mxu1 %v161_v57  ;;  %v164_v6 = vld.sshfl [vmem:[#allocation1 + $0x20] sm:$0xff pattern:$0x73625140]  ;;  %v352_v9 = vld [vmem:[%s905_s3 + $0x78] sm:$0xff]  ;;  %v351_v11 = vld [vmem:[%s905_s3 + $0x70] sm:$0xff] }
  0x3f   :  { %269 = vmatpush.msrb.mxu0 %v89_v58  ;;  %288 = vmatpush.msrb.mxu1 %v106_v59  ;;  %v103_v8 = vld [vmem:[%s903_s1 + $0x280] sm:$0xff]  ;;  %v165_v10 = vld.sshfl [vmem:[#allocation1 + $0x28] sm:$0xff pattern:$0x73625140]  ;;  %v348_v14 = vld [vmem:[%s905_s3 + $0x58] sm:$0xff] }
  0x40   :  { %310 = vmatpush.msrb.mxu2 %v120_v60  ;;  %329 = vmatpush.msrb.mxu3 %v137_v61  ;;  %v350_v12 = vld [vmem:[%s905_s3 + $0x68] sm:$0xff]  ;;  %v349_v13 = vld [vmem:[%s905_s3 + $0x60] sm:$0xff]  ;;  %v347_v15 = vld [vmem:[%s905_s3 + $0x50] sm:$0xff] }
  0x41   :  { %270 = vmatpush.msrb.mxu0 %v88_v62  ;;  %289 = vmatpush.msrb.mxu1 %v105_v63  ;;  %v346_v16 = vld [vmem:[%s905_s3 + $0x48] sm:$0xff]  ;;  %v345_v17 = vld [vmem:[%s905_s3 + $0x40] sm:$0xff]  ;;  %v344_v18 = vld [vmem:[%s905_s3 + $0x38] sm:$0xff] }
  0x42   :  { %311 = vmatpush.msrb.mxu2 %v119_v0  ;;  %330 = vmatpush.msrb.mxu3 %v136_v1  ;;  %v343_v19 = vld [vmem:[%s905_s3 + $0x30] sm:$0xff]  ;;  %v342_v20 = vld [vmem:[%s905_s3 + $0x28] sm:$0xff]  ;;  %v341_v21 = vld [vmem:[%s905_s3 + $0x20] sm:$0xff] }
  0x43   :  { %312 = vmatmul.f32.vlgmr.msrb.gmra.mxu2 %v166_v2  ;;  %271 = vmatpush.msrb.mxu0 %v87_v3  ;;  %v340_v22 = vld [vmem:[%s905_s3 + $0x18] sm:$0xff]  ;;  %v339_v23 = vld [vmem:[%s905_s3 + $0x10] sm:$0xff]  ;;  %v338_v24 = vld [vmem:[%s905_s3 + $0x8] sm:$0xff] }
  0x44   :  { %290 = vmatpush.msrb.mxu1 %v104_v4  ;;  %331 = vmatpush.msrb.mxu3 %v135_v5  ;;  %v337_v25 = vld [vmem:[%s905_s3] sm:$0xff] }
  0x45   :  { %272 = vmatmul.f32.vlgmr.msrb.gmra.mxu0 %v164_v6  ;;  %332 = vmatmul.f32.vlgmr.msrb.gmra.mxu3 %v167_v7  ;;  %v396_v26 = vld [vmem:[%s904_s2] ss:$0 sm:$0xff] }
  0x46   :  { %291 = vmatpush.msrb.mxu1 %v103_v8  ;;  %357 = vmatpush.msra.mxu0 %v352_v9  ;;  %v397_v44 = vld [vmem:[%s906_s4] ss:$0 sm:$0xff] }
  0x47   :  { %292 = vmatmul.f32.vlgmr.msrb.gmra.mxu1 %v165_v10 }
  0x48   :  { %358 = vmatpush.msra.mxu0 %v351_v11 }
  0x4a   :  { %359 = vmatpush.msra.mxu0 %v350_v12 }
  0x4c   :  { %360 = vmatpush.msra.mxu0 %v349_v13 }
  0x4e   :  { %361 = vmatpush.msra.mxu0 %v348_v14 }
  0x50   :  { %362 = vmatpush.msra.mxu0 %v347_v15 }
  0x52   :  { %363 = vmatpush.msra.mxu0 %v346_v16 }
  0x54   :  { %364 = vmatpush.msra.mxu0 %v345_v17 }
  0x56   :  { %365 = vmatpush.msra.mxu0 %v344_v18 }
  0x58   :  { %366 = vmatpush.msra.mxu0 %v343_v19 }
  0x5a   :  { %367 = vmatpush.msra.mxu0 %v342_v20 }
  0x5c   :  { %368 = vmatpush.msra.mxu0 %v341_v21 }
  0x5e   :  { %369 = vmatpush.msra.mxu0 %v340_v22 }
  0x60   :  { %370 = vmatpush.msra.mxu0 %v339_v23 }
  0x62   :  { %371 = vmatpush.msra.mxu0 %v338_v24 }
  0x64   :  { %372 = vmatpush.msra.mxu0 %v337_v25 }
  0xb8   :  { %v193_v27 = vpop.f32.mrf.mxu0 }
  0xb9   :  { %v194_v28 = vadd.f32 %v396_v26, %v193_v27 }
  0xbb   :  { %v213_v29 = vpop.f32.mrf.mxu1 }
  0xbc   :  { %v214_v30 = vadd.f32 %v213_v29, %v194_v28  ;;  %v233_v31 = vpop.f32.mrf.mxu2 }
  0xbe   :  { %v234_v32 = vadd.f32 %v233_v31, %v214_v30 }
  0xbf   :  { %v253_v33 = vpop.f32.mrf.mxu3 }
  0xc0   :  { %v254_v34 = vadd.f32 %v253_v33, %v234_v32 }
  0xc2   :  { %v273_v35 = vpop.f32.mrf.mxu0 }
  0xc3   :  { %v274_v36 = vadd.f32 %v273_v35, %v254_v34 }
  0xc4   :  { %v293_v37 = vpop.f32.mrf.mxu1 }
  0xc5   :  { %v294_v38 = vadd.f32 %v293_v37, %v274_v36 }
  0xc6   :  { %v313_v39 = vpop.f32.mrf.mxu2 }
  0xc7   :  { %v314_v40 = vadd.f32 %v313_v39, %v294_v38 }
  0xc8   :  { %v333_v41 = vpop.f32.mrf.mxu3 }
  0xc9   :  { %v334_v42 = vadd.f32 %v333_v41, %v314_v40 }
  0xcb   :  { %v336_v43 = vmax.f32 %v334_v42, 0.0 }
  0xcd   :  { %373 = vmatmul.f32.vlgmr.msra.gmra.mxu0 %v336_v43 }
 0x14a   :  { %v374_v45 = vpop.f32.mrf.mxu0 }
 0x14b   :  { %v375_v46 = vadd.f32 %v397_v44, %v374_v45 }
 0x14d   :  { %378 = vst.msk [vmem:[#allocation2] sm:$0x3] %vm377_vm0, %v375_v46 }
 0x14e   :  { %389 = dma.vmem_to_hbm [thread:$0]  %s385_s6, 32, %s387_s9, [#allocation3]  }
 0x14f   :  { %422 = dma.done.wait [#allocation3], 32  }
 0x150   :  { %423 = vsyncadd [#allocation3], 4294967264 }
 0x151   :  { %394 = vsyncpa [#allocation3], 1 }

</bundles_post_ra>
